<compile_context>
chip_gen: v7x
topology: tpu7x:2x2x1
jax: 0.10.0
libtpu: 0.0.40
codegen_flags: <defaults>
</compile_context>

<pallas_src>
import jax
import jax.numpy as jnp
from jax.experimental import pallas as pl
from jax.experimental.pallas import tpu as pltpu

LANE = 128  # TPU vreg lane width


def _ceil_to(n, m):
    return ((n + m - 1) // m) * m


def _pad2d(a, rows, cols):
    return jnp.pad(a, ((0, rows - a.shape[0]), (0, cols - a.shape[1])))


# ----------------------------------------------------------------------------- kernel


def _combined_kernel(x_ref, w1_ref, b1_ref, wmu_ref, bmu_ref, wlv_ref, blv_ref,
                     eps_ref, w3_ref, b3_ref, w4_ref, b4_ref, out_ref):
    """One batch tile of: VAE encoder -> reparameterize -> 2-layer MLP head.

    Matmuls run on the MXU in the weights' compute dtype (bf16) with f32 accumulation;
    all elementwise math (bias adds, ReLU, exp / reparameterization) stays in f32.
    """
    cdt = w1_ref.dtype                 # MXU compute dtype (bfloat16)

    # --- VAE encoder hidden layer (x cast to bf16 in-kernel; cast rides the VPU slot) ---
    xc = x_ref[...].astype(cdt)
    h = jnp.dot(xc, w1_ref[...], preferred_element_type=jnp.float32)
    h = jnp.maximum(h + b1_ref[...], 0.0)                       # ReLU, f32
    hb = h.astype(cdt)

    # --- mu / logvar heads at natural latent width (no padded lanes to mask) ---
    mu = jnp.dot(hb, wmu_ref[...], preferred_element_type=jnp.float32) + bmu_ref[...]
    logvar = jnp.dot(hb, wlv_ref[...], preferred_element_type=jnp.float32) + blv_ref[...]

    # --- reparameterization: z = mu + exp(0.5*logvar) * eps (f32 on VPU/EUP) ---
    z = mu + jnp.exp(0.5 * logvar) * eps_ref[...]

    # --- MLP head ---
    h2 = jnp.dot(z.astype(cdt), w3_ref[...], preferred_element_type=jnp.float32)
    h2 = jnp.maximum(h2 + b3_ref[...], 0.0)                     # ReLU, f32
    out = jnp.dot(h2.astype(cdt), w4_ref[...], preferred_element_type=jnp.float32)
    out = out + b4_ref[...]
    out_ref[...] = out.astype(out_ref.dtype)                    # bf16, lane-dense store


# ------------------------------------------------------------------------- param prep


def prepare_params(params, compute_dtype=jnp.bfloat16):
    """Pad only the dims that feed a lane-dense HBM stream (w1 in/out, w4 out) to 128;
    keep the latent / mlp-hidden dims at natural width (blocks equal to the full array
    dims are legal).  Cast matmul weights to the compute dtype; biases stay f32."""
    w1, b1 = params["w1"], params["b1"]
    wmu, bmu = params["wmu"], params["bmu"]
    wlv, blv = params["wlv"], params["blv"]
    w3, b3 = params["w3"], params["b3"]
    w4, b4 = params["w4"], params["b4"]

    in_dim, hidden = w1.shape
    latent = wmu.shape[1]
    mlp_hidden = w3.shape[1]
    out_dim = w4.shape[1]

    in_p = _ceil_to(in_dim, LANE)
    hid_p = _ceil_to(hidden, LANE)
    out_p = _ceil_to(out_dim, LANE)

    w1p = _pad2d(w1, in_p, hid_p).astype(compute_dtype)
    b1p = _pad2d(b1, 1, hid_p).astype(jnp.float32)

    wmup = _pad2d(wmu, hid_p, latent).astype(compute_dtype)
    bmup = bmu.astype(jnp.float32)
    wlvp = _pad2d(wlv, hid_p, latent).astype(compute_dtype)
    blvp = blv.astype(jnp.float32)

    w3p = w3.astype(compute_dtype)                  # (latent, mlp_hidden), natural
    b3p = b3.astype(jnp.float32)
    w4p = _pad2d(w4, mlp_hidden, out_p).astype(compute_dtype)
    b4p = _pad2d(b4, 1, out_p).astype(jnp.float32)

    dims = dict(in_dim=in_dim, in_p=in_p, hid_p=hid_p, latent=latent,
                mlp_hid=mlp_hidden, out_dim=out_dim, out_p=out_p)
    return dict(w1=w1p, b1=b1p, wmu=wmup, bmu=bmup, wlv=wlvp, blv=blvp,
                w3=w3p, b3=b3p, w4=w4p, b4=b4p, dims=dims)


# -------------------------------------------------------------------- footprint / tile


def _vmem_bytes(tb, d):
    """Rough VMEM footprint (double-buffered streams + resident weights + intermediates)."""
    x_tile = tb * d["in_p"] * 4
    eps_tile = tb * d["latent"] * 4
    out_tile = tb * d["out_p"] * 2
    w_bytes = 2 * (d["in_p"] * d["hid_p"] + 2 * d["hid_p"] * d["latent"]
                   + d["latent"] * d["mlp_hid"] + d["mlp_hid"] * d["out_p"])
    b_bytes = 4 * (d["hid_p"] + 2 * d["latent"] + d["mlp_hid"] + d["out_p"])
    interm = tb * 4 * (d["in_p"] // 2 + d["hid_p"] + 4 * d["latent"]
                       + d["mlp_hid"] + d["out_p"])
    return 2 * (x_tile + eps_tile + out_tile) + 2 * (w_bytes + b_bytes) + interm


def _pick_tile(B, tb):
    """Adaptive batch tile: multiple of 16 (bf16 sublane-safe), clamped for tiny batches,
    split so that larger batches always get >= 2 grid steps (v7x has 2 TensorCores)."""
    tb = _ceil_to(max(int(tb), 16), 16)
    tb_eff = min(tb, _ceil_to(B, 16))
    if B >= 32 and _ceil_to(B, tb_eff) // tb_eff < 2:
        tb_eff = _ceil_to((B + 1) // 2, 16)
    b_pad = _ceil_to(B, tb_eff)
    return tb_eff, b_pad


# --------------------------------------------------------------------------- forward


def combined_model_forward(x, latent_channel, seq_length, prepared, eps, *, tb=512):
    """x: (B, C, H, W) float32 NCHW.  eps: (B, latent_channel*seq_length) float32.
    Returns MLP predictions (B, out_dim) in float32."""
    d = prepared["dims"]

    B = x.shape[0]
    x_flat = x.reshape(B, -1)                       # same as torch .view(B, -1)
    assert x_flat.shape[1] == d["in_dim"]
    assert latent_channel * seq_length == d["latent"]
    assert eps.shape == (B, d["latent"])

    tb_eff, b_pad = _pick_tile(B, tb)
    grid = (b_pad // tb_eff,)

    # x and eps stay f32 and at natural feature width; only pad when strictly required
    # (ragged batch vs. tile, or in_dim not a lane multiple) to avoid extra HBM passes.
    if b_pad != B or d["in_p"] != d["in_dim"]:
        x_in = _pad2d(x_flat, b_pad, d["in_p"])
    else:
        x_in = x_flat
    eps_in = _pad2d(eps, b_pad, d["latent"]) if b_pad != B else eps

    const = lambda i: (0, 0)   # weights/biases: DMA'd once, VMEM-resident across the grid
    in_specs = [
        pl.BlockSpec((tb_eff, d["in_p"]), lambda i: (i, 0)),      # x tile (f32)
        pl.BlockSpec((d["in_p"], d["hid_p"]), const),             # w1
        pl.BlockSpec((1, d["hid_p"]), const),                     # b1
        pl.BlockSpec((d["hid_p"], d["latent"]), const),           # wmu
        pl.BlockSpec((1, d["latent"]), const),                    # bmu
        pl.BlockSpec((d["hid_p"], d["latent"]), const),           # wlv
        pl.BlockSpec((1, d["latent"]), const),                    # blv
        pl.BlockSpec((tb_eff, d["latent"]), lambda i: (i, 0)),    # eps tile (natural width)
        pl.BlockSpec((d["latent"], d["mlp_hid"]), const),         # w3
        pl.BlockSpec((1, d["mlp_hid"]), const),                   # b3
        pl.BlockSpec((d["mlp_hid"], d["out_p"]), const),          # w4
        pl.BlockSpec((1, d["out_p"]), const),                     # b4
    ]
    out_specs = pl.BlockSpec((tb_eff, d["out_p"]), lambda i: (i, 0))

    operands = (x_in, prepared["w1"], prepared["b1"], prepared["wmu"], prepared["bmu"],
                prepared["wlv"], prepared["blv"], eps_in, prepared["w3"], prepared["b3"],
                prepared["w4"], prepared["b4"])

    flops = 2 * b_pad * (d["in_p"] * d["hid_p"] + 2 * d["hid_p"] * d["latent"]
                         + d["latent"] * d["mlp_hid"] + d["mlp_hid"] * d["out_p"])
    bytes_accessed = sum(int(a.size) * a.dtype.itemsize for a in operands)
    bytes_accessed += b_pad * d["out_p"] * 2        # bf16 output writeback

    # Derived VMEM limit (footprint + margin), capped under v7x's 32 MiB scoped default.
    vmem_limit = int(min(max(2 * _vmem_bytes(tb_eff, d) + (2 << 20), 8 << 20), 32 << 20))

    out_padded = pl.pallas_call(
        _combined_kernel,
        grid=grid,
        in_specs=in_specs,
        out_specs=out_specs,
        out_shape=jax.ShapeDtypeStruct((b_pad, d["out_p"]), jnp.bfloat16),
        compiler_params=pltpu.CompilerParams(
            dimension_semantics=("parallel",),       # megacore-shard batch on v7x
            vmem_limit_bytes=vmem_limit,
        ),
        cost_estimate=pl.CostEstimate(
            flops=flops,
            transcendentals=b_pad * d["latent"],
            bytes_accessed=bytes_accessed,
        ),
    )(*operands)

    return out_padded[:B, :d["out_dim"]].astype(jnp.float32)


# ------------------------------------------------------------------------- params/ref


def init_params(key, in_dim, hidden_dim, latent_dim, mlp_hidden, out_dim):
    ks = jax.random.split(key, 8)

    def lin(k, fan_in, fan_out):
        scale = 1.0 / jnp.sqrt(jnp.float32(fan_in))
        return jax.random.uniform(k, (fan_in, fan_out), jnp.float32, -scale, scale)

    return {
        "w1":  lin(ks[0], in_dim, hidden_dim),
        "b1":  jnp.zeros((1, hidden_dim), jnp.float32),
        "wmu": lin(ks[1], hidden_dim, latent_dim),
        "bmu": jnp.zeros((1, latent_dim), jnp.float32),
        "wlv": lin(ks[2], hidden_dim, latent_dim),
        "blv": jnp.zeros((1, latent_dim), jnp.float32),
        "w3":  lin(ks[3], latent_dim, mlp_hidden),
        "b3":  jnp.zeros((1, mlp_hidden), jnp.float32),
        "w4":  lin(ks[4], mlp_hidden, out_dim),
        "b4":  jnp.zeros((1, out_dim), jnp.float32),
    }


def _reference(x, params, eps, compute_dtype=jnp.bfloat16):
    """Pure-JAX reference with the same bf16-weights / f32-accumulate numerics."""
    B = x.shape[0]
    xf = x.reshape(B, -1).astype(compute_dtype)
    c = lambda a: a.astype(compute_dtype)
    h = jnp.maximum(
        jnp.dot(xf, c(params["w1"]), preferred_element_type=jnp.float32) + params["b1"], 0.0)
    hb = h.astype(compute_dtype)
    mu = jnp.dot(hb, c(params["wmu"]), preferred_element_type=jnp.float32) + params["bmu"]
    logvar = jnp.dot(hb, c(params["wlv"]), preferred_element_type=jnp.float32) + params["blv"]
    z = mu + jnp.exp(0.5 * logvar) * eps
    h2 = jnp.maximum(
        jnp.dot(z.astype(compute_dtype), c(params["w3"]),
                preferred_element_type=jnp.float32) + params["b3"], 0.0)
    return jnp.dot(h2.astype(compute_dtype), c(params["w4"]),
                   preferred_element_type=jnp.float32) + params["b4"]


# ------------------------------------------------------------------------------- main

if __name__ == "__main__":
    # Small shapes consistent with the forward signature.
    B, C, H, W = 2, 4, 16, 16
    latent_channel, seq_length = 4, 8
    in_dim = C * H * W                         # 1024
    hidden_dim = 128
    latent_dim = latent_channel * seq_length   # 32
    mlp_hidden = 64
    out_dim = 16

    key = jax.random.PRNGKey(0)
    kx, keps, kp = jax.random.split(key, 3)
    x = jax.random.normal(kx, (B, C, H, W), jnp.float32)
    eps = jax.random.normal(keps, (B, latent_dim), jnp.float32)
    params = init_params(kp, in_dim, hidden_dim, latent_dim, mlp_hidden, out_dim)

    prepared = prepare_params(params, compute_dtype=jnp.bfloat16)
    out = combined_model_forward(x, latent_channel, seq_length, prepared, eps, tb=512)
    out = jax.block_until_ready(out)

    ref = _reference(x, params, eps)
    assert out.shape == (B, out_dim)
    # Output is stored in bf16 (final rounding only); tolerance reflects that.
    assert jnp.allclose(out, ref, atol=2e-2, rtol=2e-2), "mismatch vs reference"

    print("KERNEL_OK")
</pallas_src>

<mosaic_0001>
module attributes {stable_mosaic.version = 11 : i64} {
  func.func @_combined_kernel(%arg0: i32, %arg1: memref<16x1024xf32, #tpu.memory_space<vmem>>, %arg2: memref<1024x128xbf16, #tpu.memory_space<vmem>>, %arg3: memref<1x128xf32, #tpu.memory_space<vmem>>, %arg4: memref<128x32xbf16, #tpu.memory_space<vmem>>, %arg5: memref<1x32xf32, #tpu.memory_space<vmem>>, %arg6: memref<128x32xbf16, #tpu.memory_space<vmem>>, %arg7: memref<1x32xf32, #tpu.memory_space<vmem>>, %arg8: memref<16x32xf32, #tpu.memory_space<vmem>>, %arg9: memref<32x64xbf16, #tpu.memory_space<vmem>>, %arg10: memref<1x64xf32, #tpu.memory_space<vmem>>, %arg11: memref<64x128xbf16, #tpu.memory_space<vmem>>, %arg12: memref<1x128xf32, #tpu.memory_space<vmem>>, %arg13: memref<16x128xbf16, #tpu.memory_space<vmem>>) attributes {dimension_semantics = [#tpu.dimension_semantics<parallel>], iteration_bounds = array<i64: 1>, scalar_prefetch = 0 : i64, scratch_operands = 0 : i64, tpu.core_type = #tpu.core_type<tc>, window_params = [{transform_indices = @transform_0, window_bounds = array<i64: 16, 1024>}, {pipeline_mode = #tpu.pipeline_mode<synchronous>, transform_indices = @transform_1, window_bounds = array<i64: 1024, 128>}, {pipeline_mode = #tpu.pipeline_mode<synchronous>, transform_indices = @transform_2, window_bounds = array<i64: 1, 128>}, {pipeline_mode = #tpu.pipeline_mode<synchronous>, transform_indices = @transform_3, window_bounds = array<i64: 128, 32>}, {pipeline_mode = #tpu.pipeline_mode<synchronous>, transform_indices = @transform_4, window_bounds = array<i64: 1, 32>}, {pipeline_mode = #tpu.pipeline_mode<synchronous>, transform_indices = @transform_5, window_bounds = array<i64: 128, 32>}, {pipeline_mode = #tpu.pipeline_mode<synchronous>, transform_indices = @transform_6, window_bounds = array<i64: 1, 32>}, {transform_indices = @transform_7, window_bounds = array<i64: 16, 32>}, {pipeline_mode = #tpu.pipeline_mode<synchronous>, transform_indices = @transform_8, window_bounds = array<i64: 32, 64>}, {pipeline_mode = #tpu.pipeline_mode<synchronous>, transform_indices = @transform_9, window_bounds = array<i64: 1, 64>}, {pipeline_mode = #tpu.pipeline_mode<synchronous>, transform_indices = @transform_10, window_bounds = array<i64: 64, 128>}, {pipeline_mode = #tpu.pipeline_mode<synchronous>, transform_indices = @transform_11, window_bounds = array<i64: 1, 128>}, {transform_indices = @transform_12, window_bounds = array<i64: 16, 128>}]} {
    %c0 = arith.constant 0 : index
    %c0_0 = arith.constant 0 : index
    %0 = vector.load %arg1[%c0, %c0_0] : memref<16x1024xf32, #tpu.memory_space<vmem>>, vector<16x1024xf32>
    %1 = arith.truncf %0 : vector<16x1024xf32> to vector<16x1024xbf16>
    %c0_1 = arith.constant 0 : index
    %c0_2 = arith.constant 0 : index
    %2 = vector.load %arg2[%c0_1, %c0_2] : memref<1024x128xbf16, #tpu.memory_space<vmem>>, vector<1024x128xbf16>
    %cst = arith.constant dense<0.000000e+00> : vector<16x128xf32>
    %3 = tpu.matmul %1, %2, %cst {dimension_numbers = #tpu.dot_dimension_numbers<[1], [0], [0], [1], [0, 0, 1, 1], [], []>} : vector<16x1024xbf16>, vector<1024x128xbf16>, vector<16x128xf32> -> vector<16x128xf32>
    %c0_3 = arith.constant 0 : index
    %c0_4 = arith.constant 0 : index
    %4 = vector.load %arg3[%c0_3, %c0_4] : memref<1x128xf32, #tpu.memory_space<vmem>>, vector<1x128xf32>
    %5 = vector.broadcast %4 : vector<1x128xf32> to vector<16x128xf32>
    %6 = arith.addf %3, %5 : vector<16x128xf32>
    %cst_5 = arith.constant 0.000000e+00 : f32
    %7 = vector.broadcast %cst_5 : f32 to vector<16x128xf32>
    %8 = arith.maximumf %6, %7 : vector<16x128xf32>
    %9 = arith.truncf %8 : vector<16x128xf32> to vector<16x128xbf16>
    %c0_6 = arith.constant 0 : index
    %c0_7 = arith.constant 0 : index
    %10 = vector.load %arg4[%c0_6, %c0_7] : memref<128x32xbf16, #tpu.memory_space<vmem>>, vector<128x32xbf16>
    %cst_8 = arith.constant dense<0.000000e+00> : vector<16x32xf32>
    %11 = tpu.matmul %9, %10, %cst_8 {dimension_numbers = #tpu.dot_dimension_numbers<[1], [0], [0], [1], [0, 0, 1, 1], [], []>} : vector<16x128xbf16>, vector<128x32xbf16>, vector<16x32xf32> -> vector<16x32xf32>
    %c0_9 = arith.constant 0 : index
    %c0_10 = arith.constant 0 : index
    %12 = vector.load %arg5[%c0_9, %c0_10] : memref<1x32xf32, #tpu.memory_space<vmem>>, vector<1x32xf32>
    %13 = vector.broadcast %12 : vector<1x32xf32> to vector<16x32xf32>
    %14 = arith.addf %11, %13 : vector<16x32xf32>
    %c0_11 = arith.constant 0 : index
    %c0_12 = arith.constant 0 : index
    %15 = vector.load %arg6[%c0_11, %c0_12] : memref<128x32xbf16, #tpu.memory_space<vmem>>, vector<128x32xbf16>
    %cst_13 = arith.constant dense<0.000000e+00> : vector<16x32xf32>
    %16 = tpu.matmul %9, %15, %cst_13 {dimension_numbers = #tpu.dot_dimension_numbers<[1], [0], [0], [1], [0, 0, 1, 1], [], []>} : vector<16x128xbf16>, vector<128x32xbf16>, vector<16x32xf32> -> vector<16x32xf32>
    %c0_14 = arith.constant 0 : index
    %c0_15 = arith.constant 0 : index
    %17 = vector.load %arg7[%c0_14, %c0_15] : memref<1x32xf32, #tpu.memory_space<vmem>>, vector<1x32xf32>
    %18 = vector.broadcast %17 : vector<1x32xf32> to vector<16x32xf32>
    %19 = arith.addf %16, %18 : vector<16x32xf32>
    %cst_16 = arith.constant 5.000000e-01 : f32
    %20 = vector.broadcast %cst_16 : f32 to vector<16x32xf32>
    %21 = arith.mulf %20, %19 : vector<16x32xf32>
    %22 = math.exp %21 : vector<16x32xf32>
    %c0_17 = arith.constant 0 : index
    %c0_18 = arith.constant 0 : index
    %23 = vector.load %arg8[%c0_17, %c0_18] : memref<16x32xf32, #tpu.memory_space<vmem>>, vector<16x32xf32>
    %24 = arith.mulf %22, %23 : vector<16x32xf32>
    %25 = arith.addf %14, %24 : vector<16x32xf32>
    %26 = arith.truncf %25 : vector<16x32xf32> to vector<16x32xbf16>
    %c0_19 = arith.constant 0 : index
    %c0_20 = arith.constant 0 : index
    %27 = vector.load %arg9[%c0_19, %c0_20] : memref<32x64xbf16, #tpu.memory_space<vmem>>, vector<32x64xbf16>
    %cst_21 = arith.constant dense<0.000000e+00> : vector<16x64xf32>
    %28 = tpu.matmul %26, %27, %cst_21 {dimension_numbers = #tpu.dot_dimension_numbers<[1], [0], [0], [1], [0, 0, 1, 1], [], []>} : vector<16x32xbf16>, vector<32x64xbf16>, vector<16x64xf32> -> vector<16x64xf32>
    %c0_22 = arith.constant 0 : index
    %c0_23 = arith.constant 0 : index
    %29 = vector.load %arg10[%c0_22, %c0_23] : memref<1x64xf32, #tpu.memory_space<vmem>>, vector<1x64xf32>
    %30 = vector.broadcast %29 : vector<1x64xf32> to vector<16x64xf32>
    %31 = arith.addf %28, %30 : vector<16x64xf32>
    %cst_24 = arith.constant 0.000000e+00 : f32
    %32 = vector.broadcast %cst_24 : f32 to vector<16x64xf32>
    %33 = arith.maximumf %31, %32 : vector<16x64xf32>
    %34 = arith.truncf %33 : vector<16x64xf32> to vector<16x64xbf16>
    %c0_25 = arith.constant 0 : index
    %c0_26 = arith.constant 0 : index
    %35 = vector.load %arg11[%c0_25, %c0_26] : memref<64x128xbf16, #tpu.memory_space<vmem>>, vector<64x128xbf16>
    %cst_27 = arith.constant dense<0.000000e+00> : vector<16x128xf32>
    %36 = tpu.matmul %34, %35, %cst_27 {dimension_numbers = #tpu.dot_dimension_numbers<[1], [0], [0], [1], [0, 0, 1, 1], [], []>} : vector<16x64xbf16>, vector<64x128xbf16>, vector<16x128xf32> -> vector<16x128xf32>
    %c0_28 = arith.constant 0 : index
    %c0_29 = arith.constant 0 : index
    %37 = vector.load %arg12[%c0_28, %c0_29] : memref<1x128xf32, #tpu.memory_space<vmem>>, vector<1x128xf32>
    %38 = vector.broadcast %37 : vector<1x128xf32> to vector<16x128xf32>
    %39 = arith.addf %36, %38 : vector<16x128xf32>
    %40 = arith.truncf %39 : vector<16x128xf32> to vector<16x128xbf16>
    %c0_30 = arith.constant 0 : index
    %c0_31 = arith.constant 0 : index
    %41 = vector.load %arg13[%c0_30, %c0_31] : memref<16x128xbf16, #tpu.memory_space<vmem>>, vector<16x128xbf16>
    tpu.vector_store %arg13[%c0_30, %c0_31], %40 {strides = array<i32>} : memref<16x128xbf16, #tpu.memory_space<vmem>>, vector<16x128xbf16>,
    return
  }
  func.func @transform_0(%arg0: i32) -> (i32, i32) {
    %c0_i32 = arith.constant 0 : i32
    %c0_i32_0 = arith.constant 0 : i32
    return %arg0, %c0_i32 : i32, i32
  }
  func.func @transform_1(%arg0: i32) -> (i32, i32) {
    %c0_i32 = arith.constant 0 : i32
    %c0_i32_0 = arith.constant 0 : i32
    %c0_i32_1 = arith.constant 0 : i32
    return %c0_i32, %c0_i32_0 : i32, i32
  }
  func.func @transform_2(%arg0: i32) -> (i32, i32) {
    %c0_i32 = arith.constant 0 : i32
    %c0_i32_0 = arith.constant 0 : i32
    %c0_i32_1 = arith.constant 0 : i32
    return %c0_i32, %c0_i32_0 : i32, i32
  }
  func.func @transform_3(%arg0: i32) -> (i32, i32) {
    %c0_i32 = arith.constant 0 : i32
    %c0_i32_0 = arith.constant 0 : i32
    %c0_i32_1 = arith.constant 0 : i32
    return %c0_i32, %c0_i32_0 : i32, i32
  }
  func.func @transform_4(%arg0: i32) -> (i32, i32) {
    %c0_i32 = arith.constant 0 : i32
    %c0_i32_0 = arith.constant 0 : i32
    %c0_i32_1 = arith.constant 0 : i32
    return %c0_i32, %c0_i32_0 : i32, i32
  }
  func.func @transform_5(%arg0: i32) -> (i32, i32) {
    %c0_i32 = arith.constant 0 : i32
    %c0_i32_0 = arith.constant 0 : i32
    %c0_i32_1 = arith.constant 0 : i32
    return %c0_i32, %c0_i32_0 : i32, i32
  }
  func.func @transform_6(%arg0: i32) -> (i32, i32) {
    %c0_i32 = arith.constant 0 : i32
    %c0_i32_0 = arith.constant 0 : i32
    %c0_i32_1 = arith.constant 0 : i32
    return %c0_i32, %c0_i32_0 : i32, i32
  }
  func.func @transform_7(%arg0: i32) -> (i32, i32) {
    %c0_i32 = arith.constant 0 : i32
    %c0_i32_0 = arith.constant 0 : i32
    return %arg0, %c0_i32 : i32, i32
  }
  func.func @transform_8(%arg0: i32) -> (i32, i32) {
    %c0_i32 = arith.constant 0 : i32
    %c0_i32_0 = arith.constant 0 : i32
    %c0_i32_1 = arith.constant 0 : i32
    return %c0_i32, %c0_i32_0 : i32, i32
  }
  func.func @transform_9(%arg0: i32) -> (i32, i32) {
    %c0_i32 = arith.constant 0 : i32
    %c0_i32_0 = arith.constant 0 : i32
    %c0_i32_1 = arith.constant 0 : i32
    return %c0_i32, %c0_i32_0 : i32, i32
  }
  func.func @transform_10(%arg0: i32) -> (i32, i32) {
    %c0_i32 = arith.constant 0 : i32
    %c0_i32_0 = arith.constant 0 : i32
    %c0_i32_1 = arith.constant 0 : i32
    return %c0_i32, %c0_i32_0 : i32, i32
  }
  func.func @transform_11(%arg0: i32) -> (i32, i32) {
    %c0_i32 = arith.constant 0 : i32
    %c0_i32_0 = arith.constant 0 : i32
    %c0_i32_1 = arith.constant 0 : i32
    return %c0_i32, %c0_i32_0 : i32, i32
  }
  func.func @transform_12(%arg0: i32) -> (i32, i32) {
    %c0_i32 = arith.constant 0 : i32
    %c0_i32_0 = arith.constant 0 : i32
    return %arg0, %c0_i32 : i32, i32
  }
}

</mosaic_0001>

<bundles_post_ra>
// kernel: tpu_custom_call.1
= control target key start
LH: loop header
LB: loop body
LE: loop exit
PB: predicated region body
PF: predicated region fallthrough
CT: control target
= control target key end

     0   :  { %17 = vsyncpa [#allocation3], 0  ;;  %s1969_s0 = inlined_call_operand.vmem [shape: f32[16,1024], index: 0, kind: input, shape index: {}]   ;;  %s1970_s1 = inlined_call_operand.hbm [shape: bf16[1024,128], index: 1, kind: input, shape index: {}]   ;;  %s1971_s2 = inlined_call_operand.vmem [shape: f32[1,128], index: 2, kind: input, shape index: {}]   ;;  %s1972_s3 = inlined_call_operand.vmem [shape: bf16[128,32], index: 3, kind: input, shape index: {}]   ;;  %s1973_s4 = inlined_call_operand.vmem [shape: f32[1,32], index: 4, kind: input, shape index: {}]   ;;  %s1974_s5 = inlined_call_operand.vmem [shape: bf16[128,32], index: 5, kind: input, shape index: {}]   ;;  %s1975_s6 = inlined_call_operand.vmem [shape: f32[1,32], index: 6, kind: input, shape index: {}]   ;;  %s1976_s7 = inlined_call_operand.hbm [shape: f32[16,32], index: 7, kind: input, shape index: {}]   ;;  %s1977_s8 = inlined_call_operand.hbm [shape: bf16[32,64], index: 8, kind: input, shape index: {}]   ;;  %s1978_s9 = inlined_call_operand.vmem [shape: f32[1,64], index: 9, kind: input, shape index: {}]   ;;  %s1979_s10 = inlined_call_operand.vmem [shape: bf16[64,128], index: 10, kind: input, shape index: {}]   ;;  %s1980_s11 = inlined_call_operand.vmem [shape: f32[1,128], index: 11, kind: input, shape index: {}]   ;;  %s1981_s12 = inlined_call_operand.hbm [shape: bf16[16,128], index: 12, kind: output, shape index: {}]  }
   0x1   :  { %18 = vsyncpa [#allocation6], 0 }
   0x2   :  { %19 = vsyncpa [#allocation4], 0  ;;  %s1684_s21 = smov [#allocation5]   ;;  %s1590_s25 = scalar_lea.hbm %s1976_s7, 256 }
   0x3   :  { %s49_s22 = sshll.u32 %s1684_s21, 4  ;;  %p1591_p0 = scmp.ne.s32.totalorder %s1976_s7, %s1590_s25  ;;  %s50_s22 = int_to_ptr.vmem [resolvable:$true] %s49_s22 }
   0x4   :  { %p1594_p1 = scmp.lt.u32.totalorder %s1590_s25, %s1976_s7 }
   0x6   :  { %p1596_p2 = pnand %p1594_p1, %p1591_p0 }
   0x8   :  { %1599 = shalt.err (!%p1596_p2)
}
   0x9   :  { %s1600_s30 = scalar_lea.vmem %s50_s22, 256  ;;  %p1605_p4 = scmp.lt.s32.totalorder %s50_s22, %s50_s22 }
   0xa   :  { %p1601_p3 = scmp.ne.s32.totalorder %s50_s22, %s1600_s30  ;;  %p1606_p5 = scmp.lt.s32.totalorder %s1600_s30, %s1600_s30 }
   0xc   :  { %p1607_p6 = por %p1606_p5, %p1605_p4 }
   0xe   :  { %p1608_p7 = pnand %p1607_p6, %p1601_p3 }
  0x10   :  { %1611 = shalt.err (!%p1608_p7)
}
  0x11   :  { %s1685_s13 = smov 128   ;;  %s1686_s14 = smov 8  }
  0x12   :  { %55 = dma.hbm_to_vmem [thread:$0]  %s1976_s7, 256, %s50_s22, [#allocation6], %s1685_s13, %s1685_s13, %s1686_s14  }
  0x13   :  { %s1687_s17 = smov [#allocation2]   ;;  %s1612_s21 = scalar_lea.hbm %s1970_s1, 8192 }
  0x14   :  { %s27_s18 = sshll.u32 %s1687_s17, 4  ;;  %p1613_p8 = scmp.ne.s32.totalorder %s1970_s1, %s1612_s21  ;;  %s28_s18 = int_to_ptr.vmem [resolvable:$true] %s27_s18 }
  0x15   :  { %p1616_p9 = scmp.lt.u32.totalorder %s1612_s21, %s1970_s1 }
  0x17   :  { %p1618_p10 = pnand %p1616_p9, %p1613_p8 }
  0x19   :  { %1621 = shalt.err (!%p1618_p10)
}
  0x1a   :  { %s1622_s27 = scalar_lea.vmem %s28_s18, 8192  ;;  %p1627_p12 = scmp.lt.s32.totalorder %s28_s18, %s28_s18 }
  0x1b   :  { %p1623_p11 = scmp.ne.s32.totalorder %s28_s18, %s1622_s27  ;;  %p1628_p13 = scmp.lt.s32.totalorder %s1622_s27, %s1622_s27 }
  0x1d   :  { %p1629_p0 = por %p1628_p13, %p1627_p12 }
  0x1f   :  { %p1630_p1 = pnand %p1629_p0, %p1623_p11 }
  0x21   :  { %1633 = shalt.err (!%p1630_p1)
}
  0x22   :  { %s1688_s7 = smov 64   ;;  %s1689_s22 = smov 4  }
  0x23   :  { %33 = dma.hbm_to_vmem [thread:$0]  %s1970_s1, 8192, %s28_s18, [#allocation3], %s1688_s7, %s1688_s7, %s1689_s22  }
  0x24   :  { %s1690_s30 = smov [#allocation7]   ;;  %s1634_s16 = scalar_lea.hbm %s1977_s8, 256 }
  0x25   :  { %s61_s13 = sshll.u32 %s1690_s30, 4  ;;  %p1635_p2 = scmp.ne.s32.totalorder %s1977_s8, %s1634_s16  ;;  %s62_s13 = int_to_ptr.vmem [resolvable:$true] %s61_s13 }
  0x26   :  { %p1638_p3 = scmp.lt.u32.totalorder %s1634_s16, %s1977_s8 }
  0x28   :  { %p1640_p4 = pnand %p1638_p3, %p1635_p2 }
  0x2a   :  { %1643 = shalt.err (!%p1640_p4)
}
  0x2b   :  { %s1644_s23 = scalar_lea.vmem %s62_s13, 256  ;;  %p1649_p6 = scmp.lt.s32.totalorder %s62_s13, %s62_s13 }
  0x2c   :  { %p1645_p5 = scmp.ne.s32.totalorder %s62_s13, %s1644_s23  ;;  %p1650_p7 = scmp.lt.s32.totalorder %s1644_s23, %s1644_s23 }
  0x2e   :  { %p1651_p8 = por %p1650_p7, %p1649_p6 }
  0x30   :  { %p1652_p9 = pnand %p1651_p8, %p1645_p5 }
  0x32   :  { %1655 = shalt.err (!%p1652_p9)
}
  0x33   :  { %67 = dma.hbm_to_vmem [thread:$0]  %s1977_s8, 256, %s62_s13, [#allocation6], %s1688_s7, %s1688_s7, %s1689_s22  }
  0x34   :  { %1678 = dma.done.wait [#allocation3], 8192  }
  0x35   :  { %1679 = vsyncadd [#allocation3], 4294959104 }
  0x36   :  { %1680 = dma.done.wait [#allocation6], 512  }
  0x37   :  { %1681 = vsyncadd [#allocation6], 4294966784  ;;  %v1500_v0 = vld [vmem:[#allocation2 + $0x40] sm:$0xff]   ;;  %v1504_v4 = vld [vmem:[#allocation2 + $0x48] sm:$0xff]   ;;  %vm1692_vm0 = vmmov 0   ;;  %vm1054_vm1 = vcmask 261120  }
  0x38   :  { %v1501_v1 = vld [vmem:[#allocation2 + $0xc0] sm:$0xff]   ;;  %1316 = vmatprep.subr.bf16.mxu0 %v1500_v0  ;;  %v1505_v5 = vld [vmem:[#allocation2 + $0xc8] sm:$0xff]   ;;  %v1508_v8 = vld [vmem:[#allocation2 + $0x50] sm:$0xff]   ;;  %vm1141_vm2 = vcmask 523264  }
  0x39   :  { %v1502_v2 = vld [vmem:[#allocation2] sm:$0xff]   ;;  %1338 = vmatprep.subr.bf16.mxu1 %v1501_v1  ;;  %v1506_v6 = vld [vmem:[#allocation2 + $0x8] sm:$0xff]   ;;  %v1509_v9 = vld [vmem:[#allocation2 + $0xd0] sm:$0xff]  }
  0x3a   :  { %v1503_v3 = vld [vmem:[#allocation2 + $0x80] sm:$0xff]   ;;  %1317 = vmatpush3.bf16.msra.mxu0 %v1502_v2  ;;  %v1507_v7 = vld [vmem:[#allocation2 + $0x88] sm:$0xff]   ;;  %v1510_v10 = vld [vmem:[#allocation2 + $0x10] sm:$0xff]  }
  0x3b   :  { %1339 = vmatpush3.bf16.msra.mxu1 %v1503_v3  ;;  %1318 = vmatprep.subr.bf16.mxu0 %v1504_v4  ;;  %v1511_v11 = vld [vmem:[#allocation2 + $0x90] sm:$0xff]   ;;  %v1512_v12 = vld [vmem:[#allocation2 + $0x58] sm:$0xff]   ;;  %v1516_v16 = vld [vmem:[#allocation2 + $0x60] sm:$0xff]  }
  0x3c   :  { %1340 = vmatprep.subr.bf16.mxu1 %v1505_v5  ;;  %v1513_v13 = vld [vmem:[#allocation2 + $0xd8] sm:$0xff]   ;;  %v1517_v17 = vld [vmem:[#allocation2 + $0xe0] sm:$0xff]   ;;  %v1520_v20 = vld [vmem:[#allocation2 + $0x68] sm:$0xff]  }
  0x3d   :  { %v1514_v14 = vld [vmem:[#allocation2 + $0x18] sm:$0xff]   ;;  %v1518_v18 = vld [vmem:[#allocation2 + $0x20] sm:$0xff]   ;;  %v1521_v21 = vld [vmem:[#allocation2 + $0xe8] sm:$0xff]  }
  0x3e   :  { %1319 = vmatpush3.bf16.msra.mxu0 %v1506_v6  ;;  %v1515_v15 = vld [vmem:[#allocation2 + $0x98] sm:$0xff]   ;;  %v1519_v19 = vld [vmem:[#allocation2 + $0xa0] sm:$0xff]   ;;  %v1522_v22 = vld [vmem:[#allocation2 + $0x28] sm:$0xff]  }
  0x3f   :  { %1341 = vmatpush3.bf16.msra.mxu1 %v1507_v7  ;;  %1320 = vmatprep.subr.bf16.mxu0 %v1508_v8  ;;  %v1523_v23 = vld [vmem:[#allocation2 + $0xa8] sm:$0xff]   ;;  %v1524_v24 = vld [vmem:[#allocation2 + $0x70] sm:$0xff]   ;;  %v1528_v28 = vld [vmem:[#allocation2 + $0x78] sm:$0xff]  }
  0x40   :  { %1342 = vmatprep.subr.bf16.mxu1 %v1509_v9  ;;  %v1525_v25 = vld [vmem:[#allocation2 + $0xf0] sm:$0xff]   ;;  %v1529_v29 = vld [vmem:[#allocation2 + $0xf8] sm:$0xff]   ;;  %v85_v32 = vld [vmem:[%s1969_s0 + $0x8] sm:$0xff] }
  0x41   :  { %v1526_v26 = vld [vmem:[#allocation2 + $0x30] sm:$0xff]   ;;  %v1530_v30 = vld [vmem:[#allocation2 + $0x38] sm:$0xff]   ;;  %v93_v33 = vld [vmem:[%s1969_s0 + $0x48] sm:$0xff] }
  0x42   :  { %1321 = vmatpush3.bf16.msra.mxu0 %v1510_v10  ;;  %v1527_v27 = vld [vmem:[#allocation2 + $0xb0] sm:$0xff]   ;;  %v1531_v31 = vld [vmem:[#allocation2 + $0xb8] sm:$0xff]   ;;  %v101_v35 = vpack.c.bf16 %v93_v33, %v85_v32  ;;  %v84_v37 = vld [vmem:[%s1969_s0] sm:$0xff] }
  0x43   :  { %1343 = vmatpush3.bf16.msra.mxu1 %v1511_v11  ;;  %1322 = vmatprep.subr.bf16.mxu0 %v1512_v12  ;;  %v87_v34 = vld [vmem:[%s1969_s0 + $0x18] sm:$0xff]  ;;  %v92_v38 = vld [vmem:[%s1969_s0 + $0x40] sm:$0xff]  ;;  %v86_v41 = vld [vmem:[%s1969_s0 + $0x10] sm:$0xff] }
  0x44   :  { %1344 = vmatprep.subr.bf16.mxu1 %v1513_v13  ;;  %v95_v36 = vld [vmem:[%s1969_s0 + $0x58] sm:$0xff]  ;;  %v100_v40 = vpack.c.bf16 %v92_v38, %v84_v37  ;;  %v94_v42 = vld [vmem:[%s1969_s0 + $0x50] sm:$0xff]  ;;  %659 = vmatprep.mubr.bf16.mxu0 %v101_v35  ;;  %v1532_v44 = vld [vmem:[#allocation2 + $0x140] sm:$0xff]  }
  0x45   :  { %v103_v39 = vpack.c.bf16 %v95_v36, %v87_v34  ;;  %v102_v43 = vpack.c.bf16 %v94_v42, %v86_v41  ;;  %v1533_v45 = vld [vmem:[#allocation2 + $0x1c0] sm:$0xff]   ;;  %v1536_v48 = vld [vmem:[#allocation2 + $0x148] sm:$0xff]   ;;  %v1540_v52 = vld [vmem:[#allocation2 + $0x150] sm:$0xff]  }
  0x46   :  { %1323 = vmatpush3.bf16.msra.mxu0 %v1514_v14  ;;  %v1534_v46 = vld [vmem:[#allocation2 + $0x100] sm:$0xff]   ;;  %v1537_v49 = vld [vmem:[#allocation2 + $0x1c8] sm:$0xff]   ;;  %v1541_v53 = vld [vmem:[#allocation2 + $0x1d0] sm:$0xff]  }
  0x47   :  { %1345 = vmatpush3.bf16.msra.mxu1 %v1515_v15  ;;  %1324 = vmatprep.subr.bf16.mxu0 %v1516_v16  ;;  %v1535_v47 = vld [vmem:[#allocation2 + $0x180] sm:$0xff]   ;;  %v1538_v50 = vld [vmem:[#allocation2 + $0x108] sm:$0xff]   ;;  %v1542_v54 = vld [vmem:[#allocation2 + $0x110] sm:$0xff]  }
  0x48   :  { %1346 = vmatprep.subr.bf16.mxu1 %v1517_v17  ;;  %700 = vmatprep.mubr.bf16.mxu1 %v103_v39  ;;  %v1539_v51 = vld [vmem:[#allocation2 + $0x188] sm:$0xff]   ;;  %v1543_v55 = vld [vmem:[#allocation2 + $0x190] sm:$0xff]   ;;  %v1544_v56 = vld [vmem:[#allocation2 + $0x158] sm:$0xff]  }
  0x49   :  { %v1545_v57 = vld [vmem:[#allocation2 + $0x1d8] sm:$0xff]   ;;  %v1548_v60 = vld [vmem:[#allocation2 + $0x160] sm:$0xff]   ;;  %v1552_v0 = vld [vmem:[#allocation2 + $0x168] sm:$0xff]  }
  0x4a   :  { %1325 = vmatpush3.bf16.msra.mxu0 %v1518_v18  ;;  %v1546_v58 = vld [vmem:[#allocation2 + $0x118] sm:$0xff]   ;;  %v1549_v61 = vld [vmem:[#allocation2 + $0x1e0] sm:$0xff]   ;;  %v1553_v1 = vld [vmem:[#allocation2 + $0x1e8] sm:$0xff]  }
  0x4b   :  { %1347 = vmatpush3.bf16.msra.mxu1 %v1519_v19  ;;  %1326 = vmatprep.subr.bf16.mxu0 %v1520_v20  ;;  %v1547_v59 = vld [vmem:[#allocation2 + $0x198] sm:$0xff]   ;;  %v1550_v62 = vld [vmem:[#allocation2 + $0x120] sm:$0xff]   ;;  %v1554_v2 = vld [vmem:[#allocation2 + $0x128] sm:$0xff]  }
  0x4c   :  { %1348 = vmatprep.subr.bf16.mxu1 %v1521_v21  ;;  %v1551_v63 = vld [vmem:[#allocation2 + $0x1a0] sm:$0xff]   ;;  %v1555_v3 = vld [vmem:[#allocation2 + $0x1a8] sm:$0xff]   ;;  %v1556_v4 = vld [vmem:[#allocation2 + $0x170] sm:$0xff]  }
  0x4d   :  { %v1557_v5 = vld [vmem:[#allocation2 + $0x1f0] sm:$0xff]   ;;  %v1560_v8 = vld [vmem:[#allocation2 + $0x178] sm:$0xff]   ;;  %v89_v12 = vld [vmem:[%s1969_s0 + $0x28] sm:$0xff] }
  0x4e   :  { %1327 = vmatpush3.bf16.msra.mxu0 %v1522_v22  ;;  %v1558_v6 = vld [vmem:[#allocation2 + $0x130] sm:$0xff]   ;;  %v1561_v9 = vld [vmem:[#allocation2 + $0x1f8] sm:$0xff]   ;;  %v97_v13 = vld [vmem:[%s1969_s0 + $0x68] sm:$0xff] }
  0x4f   :  { %1349 = vmatpush3.bf16.msra.mxu1 %v1523_v23  ;;  %1328 = vmatprep.subr.bf16.mxu0 %v1524_v24  ;;  %v1559_v7 = vld [vmem:[#allocation2 + $0x1b0] sm:$0xff]   ;;  %v1562_v10 = vld [vmem:[#allocation2 + $0x138] sm:$0xff]   ;;  %v105_v16 = vpack.c.bf16 %v97_v13, %v89_v12  ;;  %v88_v18 = vld [vmem:[%s1969_s0 + $0x20] sm:$0xff] }
  0x50   :  { %1350 = vmatprep.subr.bf16.mxu1 %v1525_v25  ;;  %v1563_v11 = vld [vmem:[#allocation2 + $0x1b8] sm:$0xff]   ;;  %v96_v19 = vld [vmem:[%s1969_s0 + $0x60] sm:$0xff]  ;;  %v90_v20 = vld [vmem:[%s1969_s0 + $0x30] sm:$0xff] }
  0x51   :  { %v91_v14 = vld [vmem:[%s1969_s0 + $0x38] sm:$0xff]  ;;  %v104_v21 = vpack.c.bf16 %v96_v19, %v88_v18  ;;  %v98_v22 = vld [vmem:[%s1969_s0 + $0x70] sm:$0xff]  ;;  %v1564_v24 = vld [vmem:[%s1972_s3] sm:$0xff]  }
  0x52   :  { %1329 = vmatpush3.bf16.msra.mxu0 %v1526_v26  ;;  %v99_v15 = vld [vmem:[%s1969_s0 + $0x78] sm:$0xff]  ;;  %v106_v23 = vpack.c.bf16 %v98_v22, %v90_v20  ;;  %v1565_v25 = vld [vmem:[%s1974_s5] sm:$0xff]   ;;  %v1691_v26 = vmov 0.0   ;;  %v1574_v35 = vld [vmem:[%s1972_s3 + $0x28] sm:$0xff]  }
  0x53   :  { %1351 = vmatpush3.bf16.msra.mxu1 %v1527_v27  ;;  %1330 = vmatprep.subr.bf16.mxu0 %v1528_v28  ;;  %v107_v17 = vpack.c.bf16 %v99_v15, %v91_v14  ;;  %v1566_v27 = vld [vmem:[%s1972_s3 + $0x8] sm:$0xff]   ;;  %v1571_v32 = vld [vmem:[%s1974_s5 + $0x18] sm:$0xff]   ;;  %v1572_v33 = vld [vmem:[%s1972_s3 + $0x20] sm:$0xff]  }
  0x54   :  { %1352 = vmatprep.subr.bf16.mxu1 %v1529_v29  ;;  %v1567_v28 = vld [vmem:[%s1974_s5 + $0x8] sm:$0xff]   ;;  %v1568_v29 = vld [vmem:[%s1972_s3 + $0x10] sm:$0xff]   ;;  %v1573_v34 = vld [vmem:[%s1974_s5 + $0x20] sm:$0xff]  }
  0x55   :  { %v1575_v36 = vld [vmem:[%s1974_s5 + $0x28] sm:$0xff]   ;;  %v1576_v37 = vld [vmem:[%s1972_s3 + $0x30] sm:$0xff]   ;;  %v1578_v39 = vld [vmem:[%s1972_s3 + $0x38] sm:$0xff]  }
  0x56   :  { %1331 = vmatpush3.bf16.msra.mxu0 %v1530_v30  ;;  %v1569_v30 = vld [vmem:[%s1974_s5 + $0x10] sm:$0xff]   ;;  %v1581_v14 = vld [vmem:[#allocation7 + $0x8] sm:$0xff]   ;;  %v1582_v15 = vld [vmem:[%s1979_s10] sm:$0xff]  }
  0x57   :  { %1353 = vmatpush3.bf16.msra.mxu1 %v1531_v31  ;;  %1360 = vmatprep.subr.bf16.mxu0 %v1532_v44  ;;  %v1570_v31 = vld [vmem:[%s1972_s3 + $0x18] sm:$0xff]   ;;  %v1577_v38 = vld [vmem:[%s1974_s5 + $0x30] sm:$0xff]  }
  0x58   :  { %1382 = vmatprep.subr.bf16.mxu1 %v1533_v45  ;;  %v1580_v13 = vld [vmem:[#allocation7] sm:$0xff]  }
  0x59   :  { %660 = vmatmul.mubr.bf16.vlgmr.msra.gmra.mrb[0].mxu0 %v100_v40  ;;  %v1579_v40 = vld [vmem:[%s1974_s5 + $0x38] sm:$0xff]  }
  0x5a   :  { %701 = vmatmul.mubr.bf16.vlgmr.msra.gmra.mrb[0].mxu1 %v102_v43  ;;  %1361 = vmatpush3.bf16.msra.mxu0 %v1534_v46  ;;  %v1214_v43 = vld [vmem:[%s1971_s2] ss:$0 sm:$0xff] }
  0x5b   :  { %1383 = vmatpush3.bf16.msra.mxu1 %v1535_v47  ;;  %1362 = vmatprep.subr.bf16.mxu0 %v1536_v48 }
  0x5c   :  { %1384 = vmatprep.subr.bf16.mxu1 %v1537_v49  ;;  %741 = vmatprep.mubr.bf16.mxu0 %v105_v16  ;;  %v1583_v16 = vld [vmem:[%s1979_s10 + $0x8] sm:$0xff]  }
  0x5d   :  { %782 = vmatprep.mubr.bf16.mxu1 %v107_v17  ;;  %v1288_v17 = vld [vmem:[%s1975_s6] ss:$0 sm:$0xff] }
  0x5e   :  { %1363 = vmatpush3.bf16.msra.mxu0 %v1538_v50 }
  0x5f   :  { %1385 = vmatpush3.bf16.msra.mxu1 %v1539_v51  ;;  %1364 = vmatprep.subr.bf16.mxu0 %v1540_v52 }
  0x60   :  { %1386 = vmatprep.subr.bf16.mxu1 %v1541_v53 }
  0x62   :  { %1365 = vmatpush3.bf16.msra.mxu0 %v1542_v54 }
  0x63   :  { %1387 = vmatpush3.bf16.msra.mxu1 %v1543_v55  ;;  %1366 = vmatprep.subr.bf16.mxu0 %v1544_v56 }
  0x64   :  { %1388 = vmatprep.subr.bf16.mxu1 %v1545_v57 }
  0x66   :  { %1367 = vmatpush3.bf16.msra.mxu0 %v1546_v58 }
  0x67   :  { %1389 = vmatpush3.bf16.msra.mxu1 %v1547_v59  ;;  %1368 = vmatprep.subr.bf16.mxu0 %v1548_v60 }
  0x68   :  { %1390 = vmatprep.subr.bf16.mxu1 %v1549_v61 }
  0x6a   :  { %1369 = vmatpush3.bf16.msra.mxu0 %v1550_v62 }
  0x6b   :  { %1391 = vmatpush3.bf16.msra.mxu1 %v1551_v63  ;;  %1370 = vmatprep.subr.bf16.mxu0 %v1552_v0 }
  0x6c   :  { %1392 = vmatprep.subr.bf16.mxu1 %v1553_v1 }
  0x6e   :  { %1371 = vmatpush3.bf16.msra.mxu0 %v1554_v2 }
  0x6f   :  { %1393 = vmatpush3.bf16.msra.mxu1 %v1555_v3  ;;  %1372 = vmatprep.subr.bf16.mxu0 %v1556_v4 }
  0x70   :  { %1394 = vmatprep.subr.bf16.mxu1 %v1557_v5 }
  0x72   :  { %1373 = vmatpush3.bf16.msra.mxu0 %v1558_v6 }
  0x73   :  { %1395 = vmatpush3.bf16.msra.mxu1 %v1559_v7  ;;  %1374 = vmatprep.subr.bf16.mxu0 %v1560_v8 }
  0x74   :  { %1396 = vmatprep.subr.bf16.mxu1 %v1561_v9 }
  0x76   :  { %1375 = vmatpush3.bf16.msra.mxu0 %v1562_v10 }
  0x77   :  { %1397 = vmatpush3.bf16.msra.mxu1 %v1563_v11  ;;  %1430 = vmatprep.subr.bf16.mxu0 %v1691_v26 }
  0x78   :  { %1450 = vmatprep.subr.bf16.mxu1 %v1691_v26 }
  0x79   :  { %742 = vmatmul.mubr.bf16.vlgmr.msra.gmra.mrb[4].mxu0 %v104_v21 }
  0x7a   :  { %783 = vmatmul.mubr.bf16.vlgmr.msra.gmra.mrb[4].mxu1 %v106_v23  ;;  %1431 = vmatpush3.bf16.msra.mxu0 %v1564_v24 }
  0x7b   :  { %1451 = vmatpush3.bf16.msra.mxu1 %v1565_v25  ;;  %1432 = vmatprep.subr.bf16.mxu0 %v1691_v26 }
  0x7c   :  { %1452 = vmatprep.subr.bf16.mxu1 %v1691_v26  ;;  %1446 = vmatprep.mubr.msk.bf16.mxu0 %vm1692_vm0, %v1691_v26 }
  0x7d   :  { %1466 = vmatprep.mubr.msk.bf16.mxu1 %vm1692_vm0, %v1691_v26 }
  0x7e   :  { %1433 = vmatpush3.bf16.msra.mxu0 %v1566_v27 }
  0x7f   :  { %1453 = vmatpush3.bf16.msra.mxu1 %v1567_v28  ;;  %1434 = vmatprep.subr.bf16.mxu0 %v1691_v26 }
  0x80   :  { %1454 = vmatprep.subr.bf16.mxu1 %v1691_v26 }
  0x82   :  { %1435 = vmatpush3.bf16.msra.mxu0 %v1568_v29 }
  0x83   :  { %1455 = vmatpush3.bf16.msra.mxu1 %v1569_v30  ;;  %1436 = vmatprep.subr.bf16.mxu0 %v1691_v26 }
  0x84   :  { %1456 = vmatprep.subr.bf16.mxu1 %v1691_v26 }
  0x86   :  { %1437 = vmatpush3.bf16.msra.mxu0 %v1570_v31 }
  0x87   :  { %1457 = vmatpush3.bf16.msra.mxu1 %v1571_v32  ;;  %1438 = vmatprep.subr.bf16.mxu0 %v1691_v26 }
  0x88   :  { %1458 = vmatprep.subr.bf16.mxu1 %v1691_v26 }
  0x8a   :  { %1439 = vmatpush3.bf16.msra.mxu0 %v1572_v33  ;;  %v1279_v33 = vld [vmem:[%s1973_s4] ss:$0 sm:$0xff] }
  0x8b   :  { %1459 = vmatpush3.bf16.msra.mxu1 %v1573_v34  ;;  %1440 = vmatprep.subr.bf16.mxu0 %v1691_v26  ;;  %v1024_v34 = vld [vmem:[#allocation5] sm:$0xff] }
  0x8c   :  { %1460 = vmatprep.subr.bf16.mxu1 %v1691_v26 }
  0x8e   :  { %1441 = vmatpush3.bf16.msra.mxu0 %v1574_v35 }
  0x8f   :  { %1461 = vmatpush3.bf16.msra.mxu1 %v1575_v36  ;;  %1442 = vmatprep.subr.bf16.mxu0 %v1691_v26  ;;  %v1025_v36 = vld [vmem:[#allocation5 + $0x8] sm:$0xff] }
  0x90   :  { %1462 = vmatprep.subr.bf16.mxu1 %v1691_v26 }
  0x92   :  { %1443 = vmatpush3.bf16.msra.mxu0 %v1576_v37 }
  0x93   :  { %1463 = vmatpush3.bf16.msra.mxu1 %v1577_v38  ;;  %1444 = vmatprep.subr.bf16.mxu0 %v1691_v26 }
  0x94   :  { %1464 = vmatprep.subr.bf16.mxu1 %v1691_v26 }
  0x96   :  { %1445 = vmatpush3.bf16.msra.mxu0 %v1578_v39 }
  0x97   :  { %1465 = vmatpush3.bf16.msra.mxu1 %v1579_v40  ;;  %1470 = vmatprep.subr.bf16.mxu0 %v1691_v26 }
  0x98   :  { %1478 = vmatprep.subr.bf16.mxu1 %v1691_v26 }
 0x12c   :  { %v1332_v41 = vpop.f32.mrb[0].mxu0 }
 0x12d   :  { %v1354_v42 = vpop.f32.mrb[0].mxu1  ;;  %v1333_v44 = vpop.f32.mrb[1].mxu0 }
 0x12e   :  { %v1334_v45 = vadd.f32 %v1333_v44, %v1332_v41  ;;  %v1355_v46 = vpop.f32.mrb[1].mxu1  ;;  %v1335_v47 = vpop.f32.mrb[2].mxu0 }
 0x12f   :  { %v1356_v48 = vadd.f32 %v1355_v46, %v1354_v42  ;;  %v1357_v49 = vpop.f32.mrb[2].mxu1  ;;  %v1336_v50 = vpop.f32.mrb[3].mxu0  ;;  %v1585_v46 = vld [vmem:[%s1979_s10 + $0x18] sm:$0xff]  }
 0x130   :  { %v662_v51 = vadd.f32 %v1334_v45, %v1214_v43  ;;  %v1337_v52 = vadd.f32 %v1336_v50, %v1335_v47  ;;  %v1358_v53 = vpop.f32.mrb[3].mxu1  ;;  %v1584_v45 = vld [vmem:[%s1979_s10 + $0x10] sm:$0xff]   ;;  %v1297_v47 = vld [vmem:[%s1978_s9] ss:$0 sm:$0xff]  ;;  %s1693_s10 = smov [#allocation8]  }
 0x131   :  { %v1359_v54 = vadd.f32 %v1358_v53, %v1357_v49  ;;  %s1201_s9 = sshll.u32 %s1693_s10, 4  ;;  %s1202_s9 = int_to_ptr.vmem [resolvable:$true] %s1201_s9 }
 0x132   :  { %v703_v55 = vadd.f32 %v1356_v48, %v662_v51  ;;  %v665_v56 = vadd.f32 %v1337_v52, %v1214_v43  ;;  %s1656_s1 = scalar_lea.vmem %s1202_s9, 128  ;;  %p1661_p11 = scmp.lt.s32.totalorder %s1202_s9, %s1202_s9 }
 0x133   :  { %p1657_p10 = scmp.ne.s32.totalorder %s1202_s9, %s1656_s1  ;;  %p1662_p12 = scmp.lt.s32.totalorder %s1656_s1, %s1656_s1 }
 0x134   :  { %v706_v57 = vadd.f32 %v1359_v54, %v665_v56 }
 0x135   :  { %p1663_p13 = por %p1662_p12, %p1661_p11 }
 0x137   :  { %p1664_p0 = pnand %p1663_p13, %p1657_p10 }
 0x14c   :  { %v1376_v58 = vpop.f32.mrb[4].mxu0 }
 0x14d   :  { %v1398_v59 = vpop.f32.mrb[4].mxu1  ;;  %v1377_v60 = vpop.f32.mrb[5].mxu0 }
 0x14e   :  { %v1378_v61 = vadd.f32 %v1377_v60, %v1376_v58  ;;  %v1399_v62 = vpop.f32.mrb[5].mxu1  ;;  %v1379_v63 = vpop.f32.mrb[6].mxu0 }
 0x14f   :  { %v1400_v0 = vadd.f32 %v1399_v62, %v1398_v59  ;;  %v1401_v1 = vpop.f32.mrb[6].mxu1  ;;  %v1380_v2 = vpop.f32.mrb[7].mxu0 }
 0x150   :  { %v744_v3 = vadd.f32 %v1378_v61, %v703_v55  ;;  %v1381_v4 = vadd.f32 %v1380_v2, %v1379_v63  ;;  %v1402_v5 = vpop.f32.mrb[7].mxu1 }
 0x151   :  { %v1403_v6 = vadd.f32 %v1402_v5, %v1401_v1 }
 0x152   :  { %v785_v7 = vadd.f32 %v1400_v0, %v744_v3  ;;  %v747_v8 = vadd.f32 %v1381_v4, %v706_v57 }
 0x154   :  { %v788_v9 = vadd.f32 %v1403_v6, %v747_v8  ;;  %v791_v10 = vmax.f32 %v785_v7, 0.0 }
 0x156   :  { %v792_v11 = vmax.f32 %v788_v9, 0.0 }
 0x158   :  { %v793_v12 = vpack.c.bf16 %v792_v11, %v791_v10 }
 0x15a   :  { %1447 = vmatmul.mubr.bf16.vlgmr.msra.gmra.mrb[8].mxu0 %v793_v12  ;;  %1467 = vmatmul.mubr.bf16.vlgmr.msra.gmra.mrb[8].mxu1 %v793_v12 }
 0x15b   :  { %1474 = vmatprep.mubr.msk.bf16.mxu0 %vm1692_vm0, %v1691_v26  ;;  %1486 = vmatprep.mubr.msk.bf16.mxu1 %vm1692_vm0, %v1691_v26 }
 0x15c   :  { %1471 = vmatpush3.bf16.msra.mxu0 %v1580_v13  ;;  %1479 = vmatpush3.bf16.msra.mxu1 %v1582_v15 }
 0x15d   :  { %1472 = vmatprep.subr.bf16.mxu0 %v1691_v26  ;;  %1480 = vmatprep.subr.bf16.mxu1 %v1691_v26 }
 0x160   :  { %1473 = vmatpush3.bf16.msra.mxu0 %v1581_v14  ;;  %1481 = vmatpush3.bf16.msra.mxu1 %v1583_v16 }
 0x161   :  { %1482 = vmatprep.subr.bf16.mxu1 %v1691_v26 }
 0x164   :  { %1483 = vmatpush3.bf16.msra.mxu1 %v1584_v45 }
 0x165   :  { %1484 = vmatprep.subr.bf16.mxu1 %v1691_v26  ;;  %v1301_v26 = vld [vmem:[%s1980_s11] ss:$0 sm:$0xff] }
 0x168   :  { %1485 = vmatpush3.bf16.msra.mxu1 %v1585_v46 }
 0x22d   :  { %v899_v18 = vpop.f32.mrb[8].mxu0  ;;  %v1011_v19 = vpop.f32.mrb[8].mxu1 }
 0x22e   :  { %v1012_v20 = vadd.f32 %v1288_v17, %v1011_v19  ;;  %v1448_v21 = vpop.f32.mrb[9].mxu0  ;;  %v1468_v22 = vpop.f32.mrb[9].mxu1  ;;  %v900_v37 = vadd.f32 %v1279_v33, %v899_v18 }
 0x22f   :  { %v902_v23 = vpop.f32.mrb[10].mxu0  ;;  %v1014_v24 = vpop.f32.mrb[10].mxu1 }
 0x230   :  { %v1018_v25 = vmul.f32 0.5, %v1012_v20  ;;  %v1015_v27 = vadd.f32 %v1288_v17, %v1014_v24  ;;  %v1449_v28 = vpop.f32.mrb[11].mxu0  ;;  %v1469_v29 = vpop.f32.mrb[11].mxu1  ;;  %v903_v40 = vadd.f32 %v1279_v33, %v902_v23 }
 0x232   :  { %v1020_v30 = vmul.f32 1.442695, %v1018_v25  ;;  %v1019_v31 = vmul.f32 0.5, %v1015_v27 }
 0x234   :  { %1586 = vpow2.f32 %v1020_v30  ;;  %v1022_v32 = vmul.f32 1.442695, %v1019_v31 }
 0x236   :  { %1588 = vpow2.f32 %v1022_v32 }
 0x23e   :  { %v1587_v35 = vpop.eup %1586 }
 0x23f   :  { %v1026_v38 = vmul.f32 %v1587_v35, %v1024_v34 }
 0x240   :  { %v1589_v39 = vpop.eup %1588 }
 0x241   :  { %v1027_v41 = vmul.f32 %v1589_v39, %v1025_v36  ;;  %v1028_v42 = vadd.f32 %v1026_v38, %v900_v37 }
 0x243   :  { %v1029_v43 = vadd.f32 %v1027_v41, %v903_v40 }
 0x245   :  { %v1030_v44 = vpack.c.bf16 %v1029_v43, %v1028_v42 }
 0x247   :  { %1475 = vmatmul.mubr.msk.bf16.vlgmr.msra.gmra.mrb[12].mxu0 %vm1054_vm1, %v1030_v44 }
 0x31a   :  { %v1092_v48 = vpop.f32.mrb[12].mxu0 }
 0x31b   :  { %v1093_v49 = vadd.f32 %v1297_v47, %v1092_v48  ;;  %v1476_v50 = vpop.f32.mrb[13].mxu0 }
 0x31c   :  { %v1095_v51 = vpop.f32.mrb[14].mxu0 }
 0x31d   :  { %v1096_v52 = vadd.f32 %v1297_v47, %v1095_v51  ;;  %v1477_v53 = vpop.f32.mrb[15].mxu0  ;;  %v1099_v54 = vmax.f32 %v1093_v49, 0.0 }
 0x31f   :  { %v1100_v55 = vmax.f32 %v1096_v52, 0.0 }
 0x321   :  { %v1101_v56 = vpack.c.bf16 %v1100_v55, %v1099_v54 }
 0x323   :  { %1487 = vmatmul.mubr.msk.bf16.vlgmr.msra.gmra.mrb[12].mxu1 %vm1141_vm2, %v1101_v56 }
 0x3f6   :  { %v1179_v57 = vpop.f32.mrb[12].mxu1 }
 0x3f7   :  { %v1488_v58 = vpop.f32.mrb[13].mxu1  ;;  %v1180_v60 = vadd.f32 %v1301_v26, %v1179_v57 }
 0x3f8   :  { %v1182_v59 = vpop.f32.mrb[14].mxu1 }
 0x3f9   :  { %v1183_v61 = vadd.f32 %v1301_v26, %v1182_v59  ;;  %v1489_v62 = vpop.f32.mrb[15].mxu1 }
 0x3fb   :  { %v1314_v63 = vpack.c.bf16 %v1183_v61, %v1180_v60 }
 0x3fd   :  { %1315 = vst [vmem:[#allocation8] sm:$0xff] %v1314_v63  }
 0x3fe   :  { %1667 = shalt.err (!%p1664_p0)
}
 0x3ff   :  { %s1668_s8 = scalar_lea.hbm %s1981_s12, 128 }
 0x400   :  { %p1669_p1 = scmp.ne.s32.totalorder %s1981_s12, %s1668_s8  ;;  %p1672_p2 = scmp.lt.u32.totalorder %s1668_s8, %s1981_s12 }
 0x402   :  { %p1674_p3 = pnand %p1672_p2, %p1669_p1 }
 0x404   :  { %1677 = shalt.err (!%p1674_p3)
}
 0x405   :  { %1207 = dma.vmem_to_hbm [thread:$0]  %s1202_s9, 128, %s1981_s12, [#allocation4], %s1688_s7, %s1688_s7, %s1689_s22  }
 0x406   :  { %1682 = dma.done.wait [#allocation4], 128  }
 0x407   :  { %1683 = vsyncadd [#allocation4], 4294967168 }
 0x408   :  { %1211 = vsyncpa [#allocation3], 1 }
 0x409   :  { %1212 = vsyncpa [#allocation6], 1 }
 0x40a   :  { %1213 = vsyncpa [#allocation4], 1 }

</bundles_post_ra>
